<compile_context>
chip_gen: v5e
topology: v5e:2x2
jax: 0.10.0
libtpu: 0.0.40
codegen_flags: <defaults>
</compile_context>

<pallas_src>
import jax
import jax.numpy as jnp
from jax.experimental import pallas as pl
from jax.experimental.pallas import tpu as pltpu

LANE = 128
SUBLANE = 8


def _round_up(n, m):
    return (n + m - 1) // m * m


def _tanh_log(z):
    # tanh(z) * log(tanh(z) * z + 1)  -- matches the PyTorch tanh_log exactly.
    # tanh(z)*z >= 0 for all real z, so log1p is always defined.
    t = jnp.tanh(z)
    return t * jnp.log1p(t * z)


def mlp_kernel(x_ref, w1_ref, b1_ref, w2_ref, b2_ref, w3_ref, b3_ref,
               w4_ref, b4_ref, w5_ref, o_ref):
    x = x_ref[...]
    h = _tanh_log(jnp.dot(x, w1_ref[...],
                          preferred_element_type=jnp.float32) + b1_ref[...])
    h = _tanh_log(jnp.dot(h, w2_ref[...],
                          preferred_element_type=jnp.float32) + b2_ref[...])
    h = _tanh_log(jnp.dot(h, w3_ref[...],
                          preferred_element_type=jnp.float32) + b3_ref[...])
    h = _tanh_log(jnp.dot(h, w4_ref[...],
                          preferred_element_type=jnp.float32) + b4_ref[...])
    # linear5 has no bias.
    o_ref[...] = jnp.dot(h, w5_ref[...],
                         preferred_element_type=jnp.float32).astype(o_ref.dtype)


def mlp_forward(x, params, *, max_batch_tile=1024):
    """x: [batch, input_dim] f32; params: w1..w5 stored as [in, out], b1..b4 as [1, out]."""
    batch, input_dim = x.shape
    hidden = params["w1"].shape[1]
    out_dim = params["w5"].shape[1]

    # Lane-dense padded feature sizes (exact: zero padding propagates zeros).
    h_pad = _round_up(hidden, LANE)
    o_pad = _round_up(out_dim, LANE)

    # Batch tile: as large as reasonable (multiple of 8), capped so double-buffered
    # tiles + intermediates stay far below v7x's 64 MiB VMEM.
    tb = min(max_batch_tile, _round_up(batch, SUBLANE))
    b_pad = _round_up(batch, tb)

    xp = jnp.pad(x, ((0, b_pad - batch), (0, 0)))

    def pad2(a, rows, cols):
        return jnp.pad(a, ((0, rows - a.shape[0]), (0, cols - a.shape[1])))

    w1 = pad2(params["w1"], input_dim, h_pad)
    w2 = pad2(params["w2"], h_pad, h_pad)
    w3 = pad2(params["w3"], h_pad, h_pad)
    w4 = pad2(params["w4"], h_pad, h_pad)
    w5 = pad2(params["w5"], h_pad, o_pad)
    b1 = pad2(params["b1"], 1, h_pad)
    b2 = pad2(params["b2"], 1, h_pad)
    b3 = pad2(params["b3"], 1, h_pad)
    b4 = pad2(params["b4"], 1, h_pad)

    # Weights/biases: constant index_map -> DMA'd once, resident across batch tiles.
    const_spec = lambda shape: pl.BlockSpec(shape, lambda i: (0, 0))

    out_padded = pl.pallas_call(
        mlp_kernel,
        out_shape=jax.ShapeDtypeStruct((b_pad, o_pad), jnp.float32),
        grid=(b_pad // tb,),
        in_specs=[
            pl.BlockSpec((tb, input_dim), lambda i: (i, 0)),   # x: pipelined over batch
            const_spec((input_dim, h_pad)),                    # w1
            const_spec((1, h_pad)),                            # b1
            const_spec((h_pad, h_pad)),                        # w2
            const_spec((1, h_pad)),                            # b2
            const_spec((h_pad, h_pad)),                        # w3
            const_spec((1, h_pad)),                            # b3
            const_spec((h_pad, h_pad)),                        # w4
            const_spec((1, h_pad)),                            # b4
            const_spec((h_pad, o_pad)),                        # w5
        ],
        out_specs=pl.BlockSpec((tb, o_pad), lambda i: (i, 0)),  # lane-dense output tile
        compiler_params=pltpu.CompilerParams(
            dimension_semantics=("parallel",),   # v7x: shard batch tiles across 2 TCs
        ),
    )(xp, w1, b1, w2, b2, w3, b3, w4, b4, w5)

    return out_padded[:batch, :out_dim]


# ---------------- deterministic parameter construction (plain JAX glue) -----

def _orthogonal(key, out_dim, in_dim):
    """Orthogonal init matching torch.nn.init.orthogonal_ semantics."""
    n = max(out_dim, in_dim)
    a = jax.random.normal(key, (n, n), dtype=jnp.float32)
    q, r = jnp.linalg.qr(a)
    q = q * jnp.sign(jnp.diagonal(r))
    return q[:out_dim, :in_dim]  # PyTorch weight layout [out, in]


def make_params(key, input_dim, hidden_dim, output_dim):
    keys = jax.random.split(key, 9)
    dims = [(hidden_dim, input_dim),   # linear1
            (hidden_dim, hidden_dim),  # linear2
            (hidden_dim, hidden_dim),  # linear3
            (hidden_dim, hidden_dim),  # linear4
            (output_dim, hidden_dim)]  # linear5 (no bias)
    params = {}
    for i, (out_d, in_d) in enumerate(dims, start=1):
        w_pt = _orthogonal(keys[i - 1], out_d, in_d)        # [out, in]
        params[f"w{i}"] = jnp.asarray(w_pt.T, jnp.float32)  # store as [in, out]
        if i < 5:
            bound = 1.0 / jnp.sqrt(jnp.float32(in_d))
            b = jax.random.uniform(keys[4 + i], (1, out_d),
                                   minval=-bound, maxval=bound,
                                   dtype=jnp.float32)
            params[f"b{i}"] = b
    return params


def mlp_reference(x, params):
    def act(z):
        t = jnp.tanh(z)
        return t * jnp.log(t * z + 1.0)
    h = act(x @ params["w1"] + params["b1"])
    h = act(h @ params["w2"] + params["b2"])
    h = act(h @ params["w3"] + params["b3"])
    h = act(h @ params["w4"] + params["b4"])
    return h @ params["w5"]


if __name__ == "__main__":
    input_dim, hidden_dim, output_dim = 4, 32, 2
    batch = 8

    key = jax.random.PRNGKey(0)
    k_x, k_p = jax.random.split(key)
    x = jax.random.normal(k_x, (batch, input_dim), dtype=jnp.float32)
    params = make_params(k_p, input_dim, hidden_dim, output_dim)

    out = mlp_forward(x, params)
    out = jax.block_until_ready(out)

    ref = mlp_reference(x, params)
    assert out.shape == (batch, output_dim)
    assert jnp.allclose(out, ref, atol=1e-5, rtol=1e-5), "mismatch vs JAX reference"

    print("KERNEL_OK")
</pallas_src>

<mosaic_0001>
module attributes {stable_mosaic.version = 11 : i64} {
  func.func @mlp_kernel(%arg0: i32, %arg1: memref<8x4xf32, #tpu.memory_space<vmem>>, %arg2: memref<4x128xf32, #tpu.memory_space<vmem>>, %arg3: memref<1x128xf32, #tpu.memory_space<vmem>>, %arg4: memref<128x128xf32, #tpu.memory_space<vmem>>, %arg5: memref<1x128xf32, #tpu.memory_space<vmem>>, %arg6: memref<128x128xf32, #tpu.memory_space<vmem>>, %arg7: memref<1x128xf32, #tpu.memory_space<vmem>>, %arg8: memref<128x128xf32, #tpu.memory_space<vmem>>, %arg9: memref<1x128xf32, #tpu.memory_space<vmem>>, %arg10: memref<128x128xf32, #tpu.memory_space<vmem>>, %arg11: memref<8x128xf32, #tpu.memory_space<vmem>>) attributes {dimension_semantics = [#tpu.dimension_semantics<parallel>], iteration_bounds = array<i64: 1>, scalar_prefetch = 0 : i64, scratch_operands = 0 : i64, tpu.core_type = #tpu.core_type<tc>, window_params = [{transform_indices = @transform_0, window_bounds = array<i64: 8, 4>}, {pipeline_mode = #tpu.pipeline_mode<synchronous>, transform_indices = @transform_1, window_bounds = array<i64: 4, 128>}, {pipeline_mode = #tpu.pipeline_mode<synchronous>, transform_indices = @transform_2, window_bounds = array<i64: 1, 128>}, {pipeline_mode = #tpu.pipeline_mode<synchronous>, transform_indices = @transform_3, window_bounds = array<i64: 128, 128>}, {pipeline_mode = #tpu.pipeline_mode<synchronous>, transform_indices = @transform_4, window_bounds = array<i64: 1, 128>}, {pipeline_mode = #tpu.pipeline_mode<synchronous>, transform_indices = @transform_5, window_bounds = array<i64: 128, 128>}, {pipeline_mode = #tpu.pipeline_mode<synchronous>, transform_indices = @transform_6, window_bounds = array<i64: 1, 128>}, {pipeline_mode = #tpu.pipeline_mode<synchronous>, transform_indices = @transform_7, window_bounds = array<i64: 128, 128>}, {pipeline_mode = #tpu.pipeline_mode<synchronous>, transform_indices = @transform_8, window_bounds = array<i64: 1, 128>}, {pipeline_mode = #tpu.pipeline_mode<synchronous>, transform_indices = @transform_9, window_bounds = array<i64: 128, 128>}, {transform_indices = @transform_10, window_bounds = array<i64: 8, 128>}]} {
    %c0 = arith.constant 0 : index
    %c0_0 = arith.constant 0 : index
    %0 = vector.load %arg1[%c0, %c0_0] : memref<8x4xf32, #tpu.memory_space<vmem>>, vector<8x4xf32>
    %c0_1 = arith.constant 0 : index
    %c0_2 = arith.constant 0 : index
    %1 = vector.load %arg2[%c0_1, %c0_2] : memref<4x128xf32, #tpu.memory_space<vmem>>, vector<4x128xf32>
    %cst = arith.constant dense<0.000000e+00> : vector<8x128xf32>
    %2 = tpu.matmul %0, %1, %cst {dimension_numbers = #tpu.dot_dimension_numbers<[1], [0], [0], [1], [0, 0, 1, 1], [], []>} : vector<8x4xf32>, vector<4x128xf32>, vector<8x128xf32> -> vector<8x128xf32>
    %c0_3 = arith.constant 0 : index
    %c0_4 = arith.constant 0 : index
    %3 = vector.load %arg3[%c0_3, %c0_4] : memref<1x128xf32, #tpu.memory_space<vmem>>, vector<1x128xf32>
    %4 = vector.broadcast %3 : vector<1x128xf32> to vector<8x128xf32>
    %5 = arith.addf %2, %4 : vector<8x128xf32>
    %6 = math.tanh %5 : vector<8x128xf32>
    %7 = arith.mulf %6, %5 : vector<8x128xf32>
    %8 = math.log1p %7 : vector<8x128xf32>
    %9 = arith.mulf %6, %8 : vector<8x128xf32>
    %c0_5 = arith.constant 0 : index
    %c0_6 = arith.constant 0 : index
    %10 = vector.load %arg4[%c0_5, %c0_6] : memref<128x128xf32, #tpu.memory_space<vmem>>, vector<128x128xf32>
    %cst_7 = arith.constant dense<0.000000e+00> : vector<8x128xf32>
    %11 = tpu.matmul %9, %10, %cst_7 {dimension_numbers = #tpu.dot_dimension_numbers<[1], [0], [0], [1], [0, 0, 1, 1], [], []>} : vector<8x128xf32>, vector<128x128xf32>, vector<8x128xf32> -> vector<8x128xf32>
    %c0_8 = arith.constant 0 : index
    %c0_9 = arith.constant 0 : index
    %12 = vector.load %arg5[%c0_8, %c0_9] : memref<1x128xf32, #tpu.memory_space<vmem>>, vector<1x128xf32>
    %13 = vector.broadcast %12 : vector<1x128xf32> to vector<8x128xf32>
    %14 = arith.addf %11, %13 : vector<8x128xf32>
    %15 = math.tanh %14 : vector<8x128xf32>
    %16 = arith.mulf %15, %14 : vector<8x128xf32>
    %17 = math.log1p %16 : vector<8x128xf32>
    %18 = arith.mulf %15, %17 : vector<8x128xf32>
    %c0_10 = arith.constant 0 : index
    %c0_11 = arith.constant 0 : index
    %19 = vector.load %arg6[%c0_10, %c0_11] : memref<128x128xf32, #tpu.memory_space<vmem>>, vector<128x128xf32>
    %cst_12 = arith.constant dense<0.000000e+00> : vector<8x128xf32>
    %20 = tpu.matmul %18, %19, %cst_12 {dimension_numbers = #tpu.dot_dimension_numbers<[1], [0], [0], [1], [0, 0, 1, 1], [], []>} : vector<8x128xf32>, vector<128x128xf32>, vector<8x128xf32> -> vector<8x128xf32>
    %c0_13 = arith.constant 0 : index
    %c0_14 = arith.constant 0 : index
    %21 = vector.load %arg7[%c0_13, %c0_14] : memref<1x128xf32, #tpu.memory_space<vmem>>, vector<1x128xf32>
    %22 = vector.broadcast %21 : vector<1x128xf32> to vector<8x128xf32>
    %23 = arith.addf %20, %22 : vector<8x128xf32>
    %24 = math.tanh %23 : vector<8x128xf32>
    %25 = arith.mulf %24, %23 : vector<8x128xf32>
    %26 = math.log1p %25 : vector<8x128xf32>
    %27 = arith.mulf %24, %26 : vector<8x128xf32>
    %c0_15 = arith.constant 0 : index
    %c0_16 = arith.constant 0 : index
    %28 = vector.load %arg8[%c0_15, %c0_16] : memref<128x128xf32, #tpu.memory_space<vmem>>, vector<128x128xf32>
    %cst_17 = arith.constant dense<0.000000e+00> : vector<8x128xf32>
    %29 = tpu.matmul %27, %28, %cst_17 {dimension_numbers = #tpu.dot_dimension_numbers<[1], [0], [0], [1], [0, 0, 1, 1], [], []>} : vector<8x128xf32>, vector<128x128xf32>, vector<8x128xf32> -> vector<8x128xf32>
    %c0_18 = arith.constant 0 : index
    %c0_19 = arith.constant 0 : index
    %30 = vector.load %arg9[%c0_18, %c0_19] : memref<1x128xf32, #tpu.memory_space<vmem>>, vector<1x128xf32>
    %31 = vector.broadcast %30 : vector<1x128xf32> to vector<8x128xf32>
    %32 = arith.addf %29, %31 : vector<8x128xf32>
    %33 = math.tanh %32 : vector<8x128xf32>
    %34 = arith.mulf %33, %32 : vector<8x128xf32>
    %35 = math.log1p %34 : vector<8x128xf32>
    %36 = arith.mulf %33, %35 : vector<8x128xf32>
    %c0_20 = arith.constant 0 : index
    %c0_21 = arith.constant 0 : index
    %37 = vector.load %arg10[%c0_20, %c0_21] : memref<128x128xf32, #tpu.memory_space<vmem>>, vector<128x128xf32>
    %cst_22 = arith.constant dense<0.000000e+00> : vector<8x128xf32>
    %38 = tpu.matmul %36, %37, %cst_22 {dimension_numbers = #tpu.dot_dimension_numbers<[1], [0], [0], [1], [0, 0, 1, 1], [], []>} : vector<8x128xf32>, vector<128x128xf32>, vector<8x128xf32> -> vector<8x128xf32>
    %c0_23 = arith.constant 0 : index
    %c0_24 = arith.constant 0 : index
    %39 = vector.load %arg11[%c0_23, %c0_24] : memref<8x128xf32, #tpu.memory_space<vmem>>, vector<8x128xf32>
    tpu.vector_store %arg11[%c0_23, %c0_24], %38 {strides = array<i32>} : memref<8x128xf32, #tpu.memory_space<vmem>>, vector<8x128xf32>,
    return
  }
  func.func @transform_0(%arg0: i32) -> (i32, i32) {
    %c0_i32 = arith.constant 0 : i32
    %c0_i32_0 = arith.constant 0 : i32
    return %arg0, %c0_i32 : i32, i32
  }
  func.func @transform_1(%arg0: i32) -> (i32, i32) {
    %c0_i32 = arith.constant 0 : i32
    %c0_i32_0 = arith.constant 0 : i32
    %c0_i32_1 = arith.constant 0 : i32
    return %c0_i32, %c0_i32_0 : i32, i32
  }
  func.func @transform_2(%arg0: i32) -> (i32, i32) {
    %c0_i32 = arith.constant 0 : i32
    %c0_i32_0 = arith.constant 0 : i32
    %c0_i32_1 = arith.constant 0 : i32
    return %c0_i32, %c0_i32_0 : i32, i32
  }
  func.func @transform_3(%arg0: i32) -> (i32, i32) {
    %c0_i32 = arith.constant 0 : i32
    %c0_i32_0 = arith.constant 0 : i32
    %c0_i32_1 = arith.constant 0 : i32
    return %c0_i32, %c0_i32_0 : i32, i32
  }
  func.func @transform_4(%arg0: i32) -> (i32, i32) {
    %c0_i32 = arith.constant 0 : i32
    %c0_i32_0 = arith.constant 0 : i32
    %c0_i32_1 = arith.constant 0 : i32
    return %c0_i32, %c0_i32_0 : i32, i32
  }
  func.func @transform_5(%arg0: i32) -> (i32, i32) {
    %c0_i32 = arith.constant 0 : i32
    %c0_i32_0 = arith.constant 0 : i32
    %c0_i32_1 = arith.constant 0 : i32
    return %c0_i32, %c0_i32_0 : i32, i32
  }
  func.func @transform_6(%arg0: i32) -> (i32, i32) {
    %c0_i32 = arith.constant 0 : i32
    %c0_i32_0 = arith.constant 0 : i32
    %c0_i32_1 = arith.constant 0 : i32
    return %c0_i32, %c0_i32_0 : i32, i32
  }
  func.func @transform_7(%arg0: i32) -> (i32, i32) {
    %c0_i32 = arith.constant 0 : i32
    %c0_i32_0 = arith.constant 0 : i32
    %c0_i32_1 = arith.constant 0 : i32
    return %c0_i32, %c0_i32_0 : i32, i32
  }
  func.func @transform_8(%arg0: i32) -> (i32, i32) {
    %c0_i32 = arith.constant 0 : i32
    %c0_i32_0 = arith.constant 0 : i32
    %c0_i32_1 = arith.constant 0 : i32
    return %c0_i32, %c0_i32_0 : i32, i32
  }
  func.func @transform_9(%arg0: i32) -> (i32, i32) {
    %c0_i32 = arith.constant 0 : i32
    %c0_i32_0 = arith.constant 0 : i32
    %c0_i32_1 = arith.constant 0 : i32
    return %c0_i32, %c0_i32_0 : i32, i32
  }
  func.func @transform_10(%arg0: i32) -> (i32, i32) {
    %c0_i32 = arith.constant 0 : i32
    %c0_i32_0 = arith.constant 0 : i32
    return %arg0, %c0_i32 : i32, i32
  }
}

</mosaic_0001>

<bundles_post_ra>
// kernel: tpu_custom_call.1
= control target key start
LH: loop header
LB: loop body
LE: loop exit
PB: predicated region body
PF: predicated region fallthrough
CT: control target
= control target key end

     0   :  { %15 = vsyncpa [#allocation3], 0  ;;  %s609_s0 = inlined_call_operand.vmem [shape: f32[8,4], index: 0, kind: input, shape index: {}]   ;;  %s610_s1 = inlined_call_operand.vmem [shape: f32[4,128], index: 1, kind: input, shape index: {}]   ;;  %s611_s2 = inlined_call_operand.vmem [shape: f32[1,128], index: 2, kind: input, shape index: {}]   ;;  %s612_s3 = inlined_call_operand.hbm [shape: f32[128,128], index: 3, kind: input, shape index: {}]   ;;  %s613_s4 = inlined_call_operand.vmem [shape: f32[1,128], index: 4, kind: input, shape index: {}]   ;;  %s614_s5 = inlined_call_operand.hbm [shape: f32[128,128], index: 5, kind: input, shape index: {}]   ;;  %s615_s6 = inlined_call_operand.vmem [shape: f32[1,128], index: 6, kind: input, shape index: {}]   ;;  %s616_s7 = inlined_call_operand.hbm [shape: f32[128,128], index: 7, kind: input, shape index: {}]   ;;  %s617_s8 = inlined_call_operand.vmem [shape: f32[1,128], index: 8, kind: input, shape index: {}]   ;;  %s618_s9 = inlined_call_operand.hbm [shape: f32[128,128], index: 9, kind: input, shape index: {}]   ;;  %s619_s10 = inlined_call_operand.hbm [shape: f32[8,128], index: 10, kind: output, shape index: {}]  }
   0x1   :  { %16 = vsyncpa [#allocation6], 0 }
   0x2   :  { %17 = vsyncpa [#allocation9], 0 }
   0x3   :  { %18 = vsyncpa [#allocation4], 0  ;;  %s44_s15 = sshll.u32 %s614_s5, 4  ;;  %s514_s16 = smov [#allocation5]   ;;  %s45_s15 = int_to_ptr.hbm [resolvable:$true] %s44_s15 }
   0x4   :  { %s46_s17 = sshll.u32 %s514_s16, 4  ;;  %s29_s20 = sshll.u32 %s612_s3, 4  ;;  %s47_s17 = int_to_ptr.vmem [resolvable:$true] %s46_s17  ;;  %s30_s20 = int_to_ptr.hbm [resolvable:$true] %s29_s20 }
   0x5   :  { %s515_s21 = smov 128   ;;  %s516_s22 = smov 8  }
   0x6   :  { %52 = dma.hbm_to_vmem [thread:$0]  %s45_s15, 2048, %s47_s17, [#allocation6], %s515_s21, %s515_s21, %s516_s22  }
   0x7   :  { %s517_s23 = smov [#allocation2]   ;;  %s59_s27 = sshll.u32 %s616_s7, 4  ;;  %s60_s27 = int_to_ptr.hbm [resolvable:$true] %s59_s27 }
   0x8   :  { %s31_s24 = sshll.u32 %s517_s23, 4  ;;  %s74_s29 = sshll.u32 %s618_s9, 4  ;;  %s32_s24 = int_to_ptr.vmem [resolvable:$true] %s31_s24  ;;  %s75_s29 = int_to_ptr.hbm [resolvable:$true] %s74_s29 }
   0x9   :  { %37 = dma.hbm_to_vmem [thread:$0]  %s30_s20, 2048, %s32_s24, [#allocation3], %s515_s21, %s515_s21, %s516_s22  }
   0xa   :  { %s518_s30 = smov [#allocation7]   ;;  %s519_s3 = smov [#allocation8]  }
   0xb   :  { %s61_s11 = sshll.u32 %s518_s30, 4  ;;  %s76_s12 = sshll.u32 %s519_s3, 4  ;;  %s62_s11 = int_to_ptr.vmem [resolvable:$true] %s61_s11  ;;  %s77_s12 = int_to_ptr.vmem [resolvable:$true] %s76_s12 }
   0xc   :  { %67 = dma.hbm_to_vmem [thread:$0]  %s60_s27, 2048, %s62_s11, [#allocation6], %s515_s21, %s515_s21, %s516_s22  }
   0xd   :  { %82 = dma.hbm_to_vmem [thread:$0]  %s75_s29, 2048, %s77_s12, [#allocation9], %s515_s21, %s515_s21, %s516_s22  }
   0xe   :  { %506 = dma.done.wait [#allocation3], 2048  }
   0xf   :  { %507 = vsyncadd [#allocation3], 4294965248 }
  0x10   :  { %508 = dma.done.wait [#allocation6], 4096  }
  0x11   :  { %509 = vsyncadd [#allocation6], 4294963200 }
  0x12   :  { %510 = dma.done.wait [#allocation9], 2048  }
  0x13   :  { %511 = vsyncadd [#allocation9], 4294965248  ;;  %vm109_vm0 = vcmask 1043456   ;;  %vm105_vm1 = vcmask 31744   ;;  %v100_v0 = vld [vmem:[%s610_s1] sm:$0xf] }
  0x14   :  { %v99_v1 = vld [vmem:[%s609_s0] sm:$0xff]  ;;  %v160_v2 = vld [vmem:[#allocation2 + $0x78] sm:$0xff]  ;;  %357 = vmatpush.msk.msra.mxu0 %vm109_vm0, %v100_v0  ;;  %v159_v3 = vld [vmem:[#allocation2 + $0x70] sm:$0xff]  ;;  %s520_s18 = smov [#allocation10]   ;;  %s345_s21 = sshll.u32 %s619_s10, 4  ;;  %s346_s21 = int_to_ptr.hbm [resolvable:$true] %s345_s21 }
  0x15   :  { %165 = vmatpush.msra.mxu1 %v160_v2  ;;  %358 = vmatmul.msk.f32.vlgmr.msra.gmra.mxu0 %vm105_vm1, %v99_v1  ;;  %v158_v4 = vld [vmem:[#allocation2 + $0x68] sm:$0xff]  ;;  %v157_v5 = vld [vmem:[#allocation2 + $0x60] sm:$0xff]  ;;  %v156_v6 = vld [vmem:[#allocation2 + $0x58] sm:$0xff]  ;;  %s343_s19 = sshll.u32 %s520_s18, 4  ;;  %s344_s19 = int_to_ptr.vmem [resolvable:$true] %s343_s19 }
  0x16   :  { %v155_v7 = vld [vmem:[#allocation2 + $0x50] sm:$0xff]  ;;  %v154_v8 = vld [vmem:[#allocation2 + $0x48] sm:$0xff]  ;;  %v153_v9 = vld [vmem:[#allocation2 + $0x40] sm:$0xff] }
  0x17   :  { %166 = vmatpush.msra.mxu1 %v159_v3  ;;  %v152_v10 = vld [vmem:[#allocation2 + $0x38] sm:$0xff]  ;;  %v151_v11 = vld [vmem:[#allocation2 + $0x30] sm:$0xff]  ;;  %v150_v12 = vld [vmem:[#allocation2 + $0x28] sm:$0xff] }
  0x18   :  { %v149_v13 = vld [vmem:[#allocation2 + $0x20] sm:$0xff]  ;;  %v148_v14 = vld [vmem:[#allocation2 + $0x18] sm:$0xff]  ;;  %v147_v15 = vld [vmem:[#allocation2 + $0x10] sm:$0xff] }
  0x19   :  { %167 = vmatpush.msra.mxu1 %v158_v4  ;;  %v146_v16 = vld [vmem:[#allocation2 + $0x8] sm:$0xff]  ;;  %v145_v17 = vld [vmem:[#allocation2] sm:$0xff]  ;;  %v212_v18 = vld [vmem:[#allocation5 + $0x78] sm:$0xff] }
  0x1a   :  { %v211_v19 = vld [vmem:[#allocation5 + $0x70] sm:$0xff]  ;;  %217 = vmatpush.msra.mxu2 %v212_v18  ;;  %v210_v20 = vld [vmem:[#allocation5 + $0x68] sm:$0xff]  ;;  %v366_v21 = vld [vmem:[%s611_s2] ss:$0 sm:$0xff] }
  0x1b   :  { %168 = vmatpush.msra.mxu1 %v157_v5  ;;  %v209_v35 = vld [vmem:[#allocation5 + $0x60] sm:$0xff]  ;;  %v208_v36 = vld [vmem:[#allocation5 + $0x58] sm:$0xff]  ;;  %v207_v37 = vld [vmem:[#allocation5 + $0x50] sm:$0xff] }
  0x1c   :  { %218 = vmatpush.msra.mxu2 %v211_v19  ;;  %v206_v38 = vld [vmem:[#allocation5 + $0x48] sm:$0xff]  ;;  %v205_v39 = vld [vmem:[#allocation5 + $0x40] sm:$0xff]  ;;  %v204_v40 = vld [vmem:[#allocation5 + $0x38] sm:$0xff] }
  0x1d   :  { %169 = vmatpush.msra.mxu1 %v156_v6  ;;  %v203_v41 = vld [vmem:[#allocation5 + $0x30] sm:$0xff]  ;;  %v202_v42 = vld [vmem:[#allocation5 + $0x28] sm:$0xff]  ;;  %v201_v43 = vld [vmem:[#allocation5 + $0x20] sm:$0xff] }
  0x1e   :  { %219 = vmatpush.msra.mxu2 %v210_v20  ;;  %v200_v44 = vld [vmem:[#allocation5 + $0x18] sm:$0xff]  ;;  %v199_v45 = vld [vmem:[#allocation5 + $0x10] sm:$0xff]  ;;  %v198_v46 = vld [vmem:[#allocation5 + $0x8] sm:$0xff] }
  0x1f   :  { %170 = vmatpush.msra.mxu1 %v155_v7  ;;  %v197_v47 = vld [vmem:[#allocation5] sm:$0xff]  ;;  %v264_v48 = vld [vmem:[#allocation7 + $0x78] sm:$0xff]  ;;  %v263_v49 = vld [vmem:[#allocation7 + $0x70] sm:$0xff] }
  0x20   :  { %220 = vmatpush.msra.mxu2 %v209_v35  ;;  %269 = vmatpush.msra.mxu3 %v264_v48  ;;  %v262_v50 = vld [vmem:[#allocation7 + $0x68] sm:$0xff]  ;;  %v367_v51 = vld [vmem:[%s613_s4] ss:$0 sm:$0xff]  ;;  %v260_v2 = vld [vmem:[#allocation7 + $0x58] sm:$0xff] }
  0x21   :  { %171 = vmatpush.msra.mxu1 %v154_v8  ;;  %v261_v1 = vld [vmem:[#allocation7 + $0x60] sm:$0xff]  ;;  %v259_v3 = vld [vmem:[#allocation7 + $0x50] sm:$0xff]  ;;  %v258_v4 = vld [vmem:[#allocation7 + $0x48] sm:$0xff] }
  0x22   :  { %221 = vmatpush.msra.mxu2 %v208_v36  ;;  %270 = vmatpush.msra.mxu3 %v263_v49  ;;  %v257_v5 = vld [vmem:[#allocation7 + $0x40] sm:$0xff]  ;;  %v256_v6 = vld [vmem:[#allocation7 + $0x38] sm:$0xff]  ;;  %v255_v7 = vld [vmem:[#allocation7 + $0x30] sm:$0xff] }
  0x23   :  { %172 = vmatpush.msra.mxu1 %v153_v9  ;;  %v254_v8 = vld [vmem:[#allocation7 + $0x28] sm:$0xff]  ;;  %v253_v9 = vld [vmem:[#allocation7 + $0x20] sm:$0xff]  ;;  %v308_v36 = vld [vmem:[#allocation8 + $0x38] sm:$0xff] }
  0x24   :  { %222 = vmatpush.msra.mxu2 %v207_v37  ;;  %271 = vmatpush.msra.mxu3 %v262_v50  ;;  %v309_v35 = vld [vmem:[#allocation8 + $0x40] sm:$0xff]  ;;  %v307_v37 = vld [vmem:[#allocation8 + $0x30] sm:$0xff] }
  0x25   :  { %173 = vmatpush.msra.mxu1 %v152_v10  ;;  %v252_v10 = vld [vmem:[#allocation7 + $0x18] sm:$0xff] }
  0x26   :  { %223 = vmatpush.msra.mxu2 %v206_v38  ;;  %272 = vmatpush.msra.mxu3 %v261_v1  ;;  %v306_v38 = vld [vmem:[#allocation8 + $0x28] sm:$0xff] }
  0x27   :  { %174 = vmatpush.msra.mxu1 %v151_v11  ;;  %v251_v11 = vld [vmem:[#allocation7 + $0x10] sm:$0xff] }
  0x28   :  { %224 = vmatpush.msra.mxu2 %v205_v39  ;;  %273 = vmatpush.msra.mxu3 %v260_v2  ;;  %v305_v39 = vld [vmem:[#allocation8 + $0x20] sm:$0xff] }
  0x29   :  { %175 = vmatpush.msra.mxu1 %v150_v12  ;;  %v250_v12 = vld [vmem:[#allocation7 + $0x8] sm:$0xff] }
  0x2a   :  { %225 = vmatpush.msra.mxu2 %v204_v40  ;;  %274 = vmatpush.msra.mxu3 %v259_v3  ;;  %v304_v40 = vld [vmem:[#allocation8 + $0x18] sm:$0xff] }
  0x2b   :  { %176 = vmatpush.msra.mxu1 %v149_v13  ;;  %v249_v13 = vld [vmem:[#allocation7] sm:$0xff] }
  0x2c   :  { %226 = vmatpush.msra.mxu2 %v203_v41  ;;  %275 = vmatpush.msra.mxu3 %v258_v4  ;;  %v303_v41 = vld [vmem:[#allocation8 + $0x10] sm:$0xff] }
  0x2d   :  { %177 = vmatpush.msra.mxu1 %v148_v14  ;;  %v316_v14 = vld [vmem:[#allocation8 + $0x78] sm:$0xff] }
  0x2e   :  { %227 = vmatpush.msra.mxu2 %v202_v42  ;;  %276 = vmatpush.msra.mxu3 %v257_v5  ;;  %v302_v42 = vld [vmem:[#allocation8 + $0x8] sm:$0xff] }
  0x2f   :  { %178 = vmatpush.msra.mxu1 %v147_v15  ;;  %v315_v15 = vld [vmem:[#allocation8 + $0x70] sm:$0xff]  ;;  %317 = vmatpush.msrb.mxu0 %v316_v14 }
  0x30   :  { %228 = vmatpush.msra.mxu2 %v201_v43  ;;  %277 = vmatpush.msra.mxu3 %v256_v6  ;;  %v301_v43 = vld [vmem:[#allocation8] sm:$0xff] }
  0x31   :  { %179 = vmatpush.msra.mxu1 %v146_v16  ;;  %v314_v16 = vld [vmem:[#allocation8 + $0x68] sm:$0xff]  ;;  %318 = vmatpush.msrb.mxu0 %v315_v15 }
  0x32   :  { %229 = vmatpush.msra.mxu2 %v200_v44  ;;  %278 = vmatpush.msra.mxu3 %v255_v7  ;;  %v369_v44 = vld [vmem:[%s617_s8] ss:$0 sm:$0xff] }
  0x33   :  { %180 = vmatpush.msra.mxu1 %v145_v17  ;;  %v368_v17 = vld [vmem:[%s615_s6] ss:$0 sm:$0xff]  ;;  %319 = vmatpush.msrb.mxu0 %v314_v16 }
  0x34   :  { %230 = vmatpush.msra.mxu2 %v199_v45  ;;  %279 = vmatpush.msra.mxu3 %v254_v8 }
  0x36   :  { %231 = vmatpush.msra.mxu2 %v198_v46  ;;  %280 = vmatpush.msra.mxu3 %v253_v9 }
  0x38   :  { %232 = vmatpush.msra.mxu2 %v197_v47  ;;  %281 = vmatpush.msra.mxu3 %v252_v10 }
  0x3a   :  { %282 = vmatpush.msra.mxu3 %v251_v11 }
  0x3c   :  { %283 = vmatpush.msra.mxu3 %v250_v12 }
  0x3e   :  { %284 = vmatpush.msra.mxu3 %v249_v13 }
  0x92   :  { %v130_v22 = vpop.f32.mrf.mxu0 }
  0x93   :  { %v131_v23 = vadd.f32 %v366_v21, %v130_v22 }
  0x95   :  { %370 = vtanh.f32 %v131_v23 }
  0x9b   :  { %v371_v24 = vpop.eup %370 }
  0x9c   :  { %v134_v25 = vmul.f32 %v371_v24, %v131_v23 }
  0x9e   :  { %v135_v26 = vadd.f32 1.0, %v134_v25  ;;  %v138_v27 = vmul.f32 -0.5, %v134_v25  ;;  %v141_v29 = vand.u32 2147483647, %v134_v25 }
  0xa0   :  { %372 = vlog2.f32 %v135_v26  ;;  %v139_v28 = vadd.f32 1.0, %v138_v27  ;;  %vm142_vm2 = vcmp.lt.f32.partialorder %v141_v29, 0.0004427343 }
  0xa2   :  { %v140_v32 = vmul.f32 %v139_v28, %v134_v25 }
  0xa6   :  { %v373_v30 = vpop.eup %372 }
  0xa7   :  { %v137_v31 = vmul.f32 0.6931472, %v373_v30 }
  0xa9   :  { %v143_v33 = vsel %vm142_vm2, %v140_v32, %v137_v31  ;;  %v313_v31 = vld [vmem:[#allocation8 + $0x60] sm:$0xff]  ;;  %v312_v32 = vld [vmem:[#allocation8 + $0x58] sm:$0xff] }
  0xaa   :  { %v144_v34 = vmul.f32 %v371_v24, %v143_v33  ;;  %320 = vmatpush.msrb.mxu0 %v313_v31  ;;  %v311_v33 = vld [vmem:[#allocation8 + $0x50] sm:$0xff] }
  0xac   :  { %181 = vmatmul.f32.vlgmr.msra.gmra.mxu1 %v144_v34  ;;  %321 = vmatpush.msrb.mxu0 %v312_v32  ;;  %v310_v34 = vld [vmem:[#allocation8 + $0x48] sm:$0xff] }
  0xae   :  { %322 = vmatpush.msrb.mxu0 %v311_v33 }
  0xb0   :  { %323 = vmatpush.msrb.mxu0 %v310_v34 }
  0xb2   :  { %324 = vmatpush.msrb.mxu0 %v309_v35 }
  0xb4   :  { %325 = vmatpush.msrb.mxu0 %v308_v36 }
  0xb6   :  { %326 = vmatpush.msrb.mxu0 %v307_v37 }
  0xb8   :  { %327 = vmatpush.msrb.mxu0 %v306_v38 }
  0xba   :  { %328 = vmatpush.msrb.mxu0 %v305_v39 }
  0xbc   :  { %329 = vmatpush.msrb.mxu0 %v304_v40 }
  0xbe   :  { %330 = vmatpush.msrb.mxu0 %v303_v41 }
  0xc0   :  { %331 = vmatpush.msrb.mxu0 %v302_v42 }
  0xc2   :  { %332 = vmatpush.msrb.mxu0 %v301_v43 }
 0x129   :  { %v182_v52 = vpop.f32.mrf.mxu1 }
 0x12a   :  { %v183_v53 = vadd.f32 %v367_v51, %v182_v52 }
 0x12c   :  { %374 = vtanh.f32 %v183_v53 }
 0x132   :  { %v375_v54 = vpop.eup %374 }
 0x133   :  { %v186_v55 = vmul.f32 %v375_v54, %v183_v53 }
 0x135   :  { %v187_v56 = vadd.f32 1.0, %v186_v55  ;;  %v190_v57 = vmul.f32 -0.5, %v186_v55  ;;  %v193_v59 = vand.u32 2147483647, %v186_v55 }
 0x137   :  { %376 = vlog2.f32 %v187_v56  ;;  %v191_v58 = vadd.f32 1.0, %v190_v57  ;;  %vm194_vm3 = vcmp.lt.f32.partialorder %v193_v59, 0.0004427343 }
 0x139   :  { %v192_v62 = vmul.f32 %v191_v58, %v186_v55 }
 0x13d   :  { %v377_v60 = vpop.eup %376 }
 0x13e   :  { %v189_v61 = vmul.f32 0.6931472, %v377_v60 }
 0x140   :  { %v195_v63 = vsel %vm194_vm3, %v192_v62, %v189_v61 }
 0x141   :  { %v196_v0 = vmul.f32 %v375_v54, %v195_v63 }
 0x143   :  { %233 = vmatmul.f32.vlgmr.msra.gmra.mxu2 %v196_v0 }
 0x1c6   :  { %v234_v18 = vpop.f32.mrf.mxu2 }
 0x1c7   :  { %v235_v19 = vadd.f32 %v368_v17, %v234_v18 }
 0x1c9   :  { %378 = vtanh.f32 %v235_v19 }
 0x1cf   :  { %v379_v20 = vpop.eup %378 }
 0x1d0   :  { %v238_v21 = vmul.f32 %v379_v20, %v235_v19 }
 0x1d2   :  { %v239_v22 = vadd.f32 1.0, %v238_v21  ;;  %v242_v23 = vmul.f32 -0.5, %v238_v21  ;;  %v245_v25 = vand.u32 2147483647, %v238_v21 }
 0x1d4   :  { %380 = vlog2.f32 %v239_v22  ;;  %v243_v24 = vadd.f32 1.0, %v242_v23  ;;  %vm246_vm4 = vcmp.lt.f32.partialorder %v245_v25, 0.0004427343 }
 0x1d6   :  { %v244_v28 = vmul.f32 %v243_v24, %v238_v21 }
 0x1da   :  { %v381_v26 = vpop.eup %380 }
 0x1db   :  { %v241_v27 = vmul.f32 0.6931472, %v381_v26 }
 0x1dd   :  { %v247_v29 = vsel %vm246_vm4, %v244_v28, %v241_v27 }
 0x1de   :  { %v248_v30 = vmul.f32 %v379_v20, %v247_v29 }
 0x1e0   :  { %285 = vmatmul.f32.vlgmr.msra.gmra.mxu3 %v248_v30 }
 0x263   :  { %v286_v45 = vpop.f32.mrf.mxu3 }
 0x264   :  { %v287_v46 = vadd.f32 %v369_v44, %v286_v45 }
 0x266   :  { %382 = vtanh.f32 %v287_v46 }
 0x26c   :  { %v383_v47 = vpop.eup %382 }
 0x26d   :  { %v290_v48 = vmul.f32 %v383_v47, %v287_v46 }
 0x26f   :  { %v291_v49 = vadd.f32 1.0, %v290_v48  ;;  %v294_v50 = vmul.f32 -0.5, %v290_v48  ;;  %v297_v52 = vand.u32 2147483647, %v290_v48 }
 0x271   :  { %384 = vlog2.f32 %v291_v49  ;;  %v295_v51 = vadd.f32 1.0, %v294_v50  ;;  %vm298_vm5 = vcmp.lt.f32.partialorder %v297_v52, 0.0004427343 }
 0x273   :  { %v296_v55 = vmul.f32 %v295_v51, %v290_v48 }
 0x277   :  { %v385_v53 = vpop.eup %384 }
 0x278   :  { %v293_v54 = vmul.f32 0.6931472, %v385_v53 }
 0x27a   :  { %v299_v56 = vsel %vm298_vm5, %v296_v55, %v293_v54 }
 0x27b   :  { %v300_v57 = vmul.f32 %v383_v47, %v299_v56 }
 0x27d   :  { %333 = vmatmul.f32.vlgmr.msrb.gmra.mxu0 %v300_v57 }
 0x2fa   :  { %v334_v58 = vpop.f32.mrf.mxu0 }
 0x2fb   :  { %337 = vst [vmem:[#allocation10] sm:$0xff] %v334_v58 }
 0x2fc   :  { %348 = dma.vmem_to_hbm [thread:$0]  %s344_s19, 128, %s346_s21, [#allocation4]  }
 0x2fd   :  { %512 = dma.done.wait [#allocation4], 128  }
 0x2fe   :  { %513 = vsyncadd [#allocation4], 4294967168 }
 0x2ff   :  { %353 = vsyncpa [#allocation3], 1 }
 0x300   :  { %354 = vsyncpa [#allocation6], 1 }
 0x301   :  { %355 = vsyncpa [#allocation9], 1 }
 0x302   :  { %356 = vsyncpa [#allocation4], 1 }

</bundles_post_ra>
